<compile_context>
chip_gen: v6e
topology: v6e:2x2x1
jax: 0.10.0
libtpu: 0.0.40
codegen_flags: <defaults>
</compile_context>

<pallas_src>
import functools
import numpy as np
import jax
import jax.numpy as jnp
from jax import lax
from jax.experimental import pallas as pl
from jax.experimental.pallas import tpu as pltpu


def _round_up(x, m):
    return ((x + m - 1) // m) * m


# --------------------------------------------------------------------------
# Pallas kernel: fused two-head linear + per-tile masked-CE partial sums
# --------------------------------------------------------------------------
def mt_classifier_kernel(x_ref, w_ref, b_ref, lbl_ref, lbla_ref,
                         logits_ref, part_ref, *, n_labels, n_labels_aux):
    """One (TILE_N, H) tile of tokens.

    x_ref      : (TILE_N, H)         activations (f32 or bf16)
    w_ref      : (H, LCAT)           fused [W | W_aux | 0-pad] weights (resident)
    b_ref      : (1, LCAT) f32       fused bias (resident)
    lbl_ref    : (TILE_N, 1) int32   main-head labels, -1 = ignore
    lbla_ref   : (TILE_N, 1) int32   aux-head  labels, -1 = ignore
    logits_ref : (TILE_N, LCAT) f32  fused, lane-dense logits output
    part_ref   : (1, 8, 128) f32     per-tile [loss_sum, cnt, loss_aux_sum,
                                     cnt_aux] in row 0, lanes 0..3
    """
    # Single fused MXU matmul for both heads (lane-dense 128-wide output).
    lg = jnp.dot(x_ref[...], w_ref[...],
                 preferred_element_type=jnp.float32) + b_ref[...]
    logits_ref[...] = lg

    n, lcat = lg.shape
    cls = lax.broadcasted_iota(jnp.int32, (n, lcat), 1)

    def masked_ce_partial(labels, col_lo, col_hi):
        # This head occupies fused columns [col_lo, col_hi); everything else
        # (the other head + lane padding) is excluded from max/logsumexp.
        in_head = (cls >= col_lo) & (cls < col_hi)
        valid = labels != -1
        lg_h = jnp.where(in_head, lg, jnp.float32(-1e30))
        m = jnp.max(lg_h, axis=-1, keepdims=True)
        e = jnp.where(in_head, jnp.exp(lg_h - m), 0.0)
        lse = m + jnp.log(jnp.sum(e, axis=-1, keepdims=True))
        picked = jnp.sum(jnp.where(cls == labels + col_lo, lg, 0.0),
                         axis=-1, keepdims=True)
        per_tok = jnp.where(valid, lse - picked, 0.0)
        return jnp.sum(per_tok), jnp.sum(valid.astype(jnp.float32))

    s0, c0 = masked_ce_partial(lbl_ref[...], 0, n_labels)
    s1, c1 = masked_ce_partial(lbla_ref[...], n_labels, n_labels + n_labels_aux)

    # Pack the 4 partial scalars into lanes 0..3 of an aligned (8,128) block.
    col = lax.broadcasted_iota(jnp.int32, (8, 128), 1)
    blk = jnp.where(col == 0, s0,
          jnp.where(col == 1, c0,
          jnp.where(col == 2, s1,
          jnp.where(col == 3, c1, 0.0))))
    part_ref[0] = blk


# --------------------------------------------------------------------------
# pallas_call wrapper: tiles over N, reduces per-tile loss partials in JAX
# --------------------------------------------------------------------------
def multitask_heads(x_flat, w_cat, b_cat, labels_flat, labels_aux_flat,
                    n_labels, n_labels_aux, *, tile_n=512):
    """x_flat: (N, H); w_cat: (H, LCAT); labels_*: (N,) int32 (-1 = ignore)."""
    N, H = x_flat.shape
    LCAT = w_cat.shape[1]

    # tile sizing: multiple of 8 sublanes, capped for VMEM across generations
    tile_n = max(8, _round_up(tile_n, 8))
    tile_n = min(tile_n, _round_up(N, 8))
    Npad = _round_up(N, tile_n)
    num_tiles = Npad // tile_n

    if Npad != N:
        x_flat = jnp.pad(x_flat, ((0, Npad - N), (0, 0)))
        labels_flat = jnp.pad(labels_flat, (0, Npad - N), constant_values=-1)
        labels_aux_flat = jnp.pad(labels_aux_flat, (0, Npad - N),
                                  constant_values=-1)

    lbl = labels_flat.reshape(Npad, 1).astype(jnp.int32)
    lbla = labels_aux_flat.reshape(Npad, 1).astype(jnp.int32)
    b2 = b_cat.reshape(1, LCAT).astype(jnp.float32)

    kernel = functools.partial(mt_classifier_kernel,
                               n_labels=n_labels, n_labels_aux=n_labels_aux)

    logits_cat, partials = pl.pallas_call(
        kernel,
        grid=(num_tiles,),
        in_specs=[
            pl.BlockSpec((tile_n, H), lambda i: (i, 0)),      # x tile (pipelined)
            pl.BlockSpec((H, LCAT), lambda i: (0, 0)),        # fused W (resident)
            pl.BlockSpec((1, LCAT), lambda i: (0, 0)),        # fused bias (resident)
            pl.BlockSpec((tile_n, 1), lambda i: (i, 0)),      # labels (VMEM)
            pl.BlockSpec((tile_n, 1), lambda i: (i, 0)),      # labels_aux (VMEM)
        ],
        out_specs=[
            pl.BlockSpec((tile_n, LCAT), lambda i: (i, 0)),   # fused logits
            pl.BlockSpec((1, 8, 128), lambda i: (i, 0, 0)),   # per-tile partials
        ],
        out_shape=[
            jax.ShapeDtypeStruct((Npad, LCAT), jnp.float32),
            jax.ShapeDtypeStruct((num_tiles, 8, 128), jnp.float32),
        ],
        compiler_params=pltpu.CompilerParams(
            dimension_semantics=("parallel",),
            vmem_limit_bytes=32 * 1024 * 1024),
    )(x_flat, w_cat, b2, lbl, lbla)

    # cross-tile reduction + guarded division (0 valid tokens -> no NaN)
    sums = jnp.sum(partials[:, 0, :4], axis=0)
    loss = sums[0] / jnp.maximum(sums[1], 1.0)
    loss_aux = sums[2] / jnp.maximum(sums[3], 1.0)
    return logits_cat[:N], loss, loss_aux


# --------------------------------------------------------------------------
# JAX glue: ragged token selection + pad_sequence(padding_value=-1)
# --------------------------------------------------------------------------
def gather_pad(values, mask, pad_value, T):
    """Select values[b, mask[b]] per row and pad to length T (pad_sequence)."""
    order = jnp.argsort(jnp.where(mask, 0, 1), axis=1, stable=True)  # True rows first
    counts = mask.sum(axis=1)
    valid = jnp.arange(T)[None, :] < counts[:, None]                 # (B, T)
    if values.ndim == 3:
        g = jnp.take_along_axis(values, order[:, :, None], axis=1)[:, :T]
        return jnp.where(valid[:, :, None], g, pad_value)
    g = jnp.take_along_axis(values, order, axis=1)[:, :T]
    return jnp.where(valid, g, pad_value)


def multitask_forward(sequence_output, label_masks, labels, labels_aux, params,
                      *, compute_dtype=jnp.float32, tile_n=512):
    """Reproduces MultiTaskClassifier.forward (eval mode) after the encoder."""
    B, S, H = sequence_output.shape
    T = int(np.max(np.asarray(label_masks).sum(axis=1)))             # pad_sequence length

    token_reprs = gather_pad(sequence_output, label_masks, -1.0, T)  # (B, T, H), pad=-1
    lbl = gather_pad(labels, label_masks, -1, T)                     # (B, T), pad=-1
    lbl_aux = gather_pad(labels_aux, label_masks, -1, T)

    # TODO(synk): nn.Dropout() (p=0.5) is identity in eval mode; training-time
    # stochastic dropout is omitted here.
    n_labels = params["w"].shape[1]
    n_labels_aux = params["wa"].shape[1]
    LCAT = _round_up(n_labels + n_labels_aux, 128)                   # lane-dense fused width

    w_cat = jnp.zeros((H, LCAT), jnp.float32)
    w_cat = w_cat.at[:, :n_labels].set(params["w"])
    w_cat = w_cat.at[:, n_labels:n_labels + n_labels_aux].set(params["wa"])
    b_cat = jnp.zeros((LCAT,), jnp.float32)
    b_cat = b_cat.at[:n_labels].set(params["b"])
    b_cat = b_cat.at[n_labels:n_labels + n_labels_aux].set(params["ba"])

    N = B * T
    x_flat = token_reprs.reshape(N, H).astype(compute_dtype)
    w_cat = w_cat.astype(compute_dtype)

    logits_cat, loss, loss_aux = multitask_heads(
        x_flat, w_cat, b_cat, lbl.reshape(N), lbl_aux.reshape(N),
        n_labels, n_labels_aux, tile_n=tile_n)

    logits = logits_cat[:, :n_labels].reshape(B, T, n_labels)
    logits_aux = logits_cat[:, n_labels:n_labels + n_labels_aux].reshape(
        B, T, n_labels_aux)
    return loss, loss_aux, logits, logits_aux, lbl, lbl_aux


# --------------------------------------------------------------------------
# Pure-JAX reference (correctness check)
# --------------------------------------------------------------------------
def ref_ce(lg, lab):
    valid = lab != -1
    lse = jax.scipy.special.logsumexp(lg, axis=-1)
    picked = jnp.take_along_axis(lg, jnp.clip(lab, 0)[:, None], axis=-1)[:, 0]
    per = jnp.where(valid, lse - picked, 0.0)
    return per.sum() / jnp.maximum(valid.sum(), 1)


if __name__ == "__main__":
    # small, module-consistent shapes (bert_dim=768 -> 32 here)
    B, S, H = 2, 16, 32
    n_labels, n_labels_aux = 8, 16

    key = jax.random.PRNGKey(0)
    k_seq, k_mask, k_lbl, k_lbla, k_w, k_b, k_wa, k_ba = jax.random.split(key, 8)

    sequence_output = jax.random.normal(k_seq, (B, S, H), dtype=jnp.float32)
    label_masks = jax.random.bernoulli(k_mask, 0.6, (B, S))
    label_masks = label_masks.at[:, 0].set(True)                     # >=1 token/row
    labels = jax.random.randint(k_lbl, (B, S), 0, n_labels, dtype=jnp.int32)
    labels_aux = jax.random.randint(k_lbla, (B, S), 0, n_labels_aux, dtype=jnp.int32)

    # deterministic Linear params (torch-style uniform(-1/sqrt(H), 1/sqrt(H)));
    # stored transposed: (H, n_labels)
    bound = 1.0 / np.sqrt(H)
    params = {
        "w":  jax.random.uniform(k_w,  (H, n_labels), minval=-bound, maxval=bound, dtype=jnp.float32),
        "b":  jax.random.uniform(k_b,  (n_labels,),   minval=-bound, maxval=bound, dtype=jnp.float32),
        "wa": jax.random.uniform(k_wa, (H, n_labels_aux), minval=-bound, maxval=bound, dtype=jnp.float32),
        "ba": jax.random.uniform(k_ba, (n_labels_aux,),   minval=-bound, maxval=bound, dtype=jnp.float32),
    }

    # small tile to exercise the multi-tile grid + cross-tile loss reduction
    loss, loss_aux, logits, logits_aux, lbl_pad, lbla_pad = jax.block_until_ready(
        multitask_forward(sequence_output, label_masks, labels, labels_aux,
                          params, compute_dtype=jnp.float32, tile_n=8))

    # ---- reference check (f32 path, tight tolerance) ----
    T = lbl_pad.shape[1]
    x_ref = gather_pad(sequence_output, label_masks, -1.0, T).reshape(B * T, H)
    ref_logits = x_ref @ params["w"] + params["b"]
    ref_logits_aux = x_ref @ params["wa"] + params["ba"]
    ref_loss = ref_ce(ref_logits, lbl_pad.reshape(-1))
    ref_loss_aux = ref_ce(ref_logits_aux, lbla_pad.reshape(-1))

    np.testing.assert_allclose(np.asarray(logits).reshape(B * T, -1),
                               np.asarray(ref_logits), rtol=1e-5, atol=1e-5)
    np.testing.assert_allclose(np.asarray(logits_aux).reshape(B * T, -1),
                               np.asarray(ref_logits_aux), rtol=1e-5, atol=1e-5)
    np.testing.assert_allclose(float(loss), float(ref_loss), rtol=1e-5, atol=1e-5)
    np.testing.assert_allclose(float(loss_aux), float(ref_loss_aux), rtol=1e-5, atol=1e-5)

    # ---- bf16 activation/weight path (halves HBM traffic), loose tolerance ----
    loss_bf, loss_aux_bf, logits_bf, _, _, _ = jax.block_until_ready(
        multitask_forward(sequence_output, label_masks, labels, labels_aux,
                          params, compute_dtype=jnp.bfloat16, tile_n=8))
    np.testing.assert_allclose(np.asarray(logits_bf).reshape(B * T, -1),
                               np.asarray(ref_logits), rtol=0.0, atol=0.1)
    np.testing.assert_allclose(float(loss_bf), float(ref_loss), rtol=0.0, atol=0.05)
    np.testing.assert_allclose(float(loss_aux_bf), float(ref_loss_aux), rtol=0.0, atol=0.05)

    print("KERNEL_OK")
</pallas_src>

<mosaic_0001>
module attributes {stable_mosaic.version = 11 : i64} {
  func.func @mt_classifier_kernel(%arg0: i32, %arg1: memref<8x32xf32, #tpu.memory_space<vmem>>, %arg2: memref<32x128xf32, #tpu.memory_space<vmem>>, %arg3: memref<1x128xf32, #tpu.memory_space<vmem>>, %arg4: memref<8x1xi32, #tpu.memory_space<vmem>>, %arg5: memref<8x1xi32, #tpu.memory_space<vmem>>, %arg6: memref<8x128xf32, #tpu.memory_space<vmem>>, %arg7: memref<1x8x128xf32, #tpu.memory_space<vmem>>) attributes {dimension_semantics = [#tpu.dimension_semantics<parallel>], iteration_bounds = array<i64: 3>, scalar_prefetch = 0 : i64, scratch_operands = 0 : i64, tpu.core_type = #tpu.core_type<tc>, window_params = [{transform_indices = @transform_0, window_bounds = array<i64: 8, 32>}, {pipeline_mode = #tpu.pipeline_mode<synchronous>, transform_indices = @transform_1, window_bounds = array<i64: 32, 128>}, {pipeline_mode = #tpu.pipeline_mode<synchronous>, transform_indices = @transform_2, window_bounds = array<i64: 1, 128>}, {transform_indices = @transform_3, window_bounds = array<i64: 8, 1>}, {transform_indices = @transform_4, window_bounds = array<i64: 8, 1>}, {transform_indices = @transform_5, window_bounds = array<i64: 8, 128>}, {transform_indices = @transform_6, window_bounds = array<i64: 1, 8, 128>}]} {
    %c0 = arith.constant 0 : index
    %c0_0 = arith.constant 0 : index
    %0 = vector.load %arg1[%c0, %c0_0] : memref<8x32xf32, #tpu.memory_space<vmem>>, vector<8x32xf32>
    %c0_1 = arith.constant 0 : index
    %c0_2 = arith.constant 0 : index
    %1 = vector.load %arg2[%c0_1, %c0_2] : memref<32x128xf32, #tpu.memory_space<vmem>>, vector<32x128xf32>
    %cst = arith.constant dense<0.000000e+00> : vector<8x128xf32>
    %2 = tpu.matmul %0, %1, %cst {dimension_numbers = #tpu.dot_dimension_numbers<[1], [0], [0], [1], [0, 0, 1, 1], [], []>} : vector<8x32xf32>, vector<32x128xf32>, vector<8x128xf32> -> vector<8x128xf32>
    %c0_3 = arith.constant 0 : index
    %c0_4 = arith.constant 0 : index
    %3 = vector.load %arg3[%c0_3, %c0_4] : memref<1x128xf32, #tpu.memory_space<vmem>>, vector<1x128xf32>
    %4 = vector.broadcast %3 : vector<1x128xf32> to vector<8x128xf32>
    %5 = arith.addf %2, %4 : vector<8x128xf32>
    %c0_5 = arith.constant 0 : index
    %c0_6 = arith.constant 0 : index
    %6 = vector.load %arg6[%c0_5, %c0_6] : memref<8x128xf32, #tpu.memory_space<vmem>>, vector<8x128xf32>
    tpu.vector_store %arg6[%c0_5, %c0_6], %5 {strides = array<i32>} : memref<8x128xf32, #tpu.memory_space<vmem>>, vector<8x128xf32>,
    %7 = tpu.iota {dimensions = array<i32: 1>} : vector<8x128xi32>
    %c0_7 = arith.constant 0 : index
    %c0_8 = arith.constant 0 : index
    %8 = vector.load %arg4[%c0_7, %c0_8] : memref<8x1xi32, #tpu.memory_space<vmem>>, vector<8x1xi32>
    %c0_i32 = arith.constant 0 : i32
    %9 = vector.broadcast %c0_i32 : i32 to vector<8x128xi32>
    %10 = arith.cmpi sge, %7, %9 : vector<8x128xi32>
    %c8_i32 = arith.constant 8 : i32
    %11 = vector.broadcast %c8_i32 : i32 to vector<8x128xi32>
    %12 = arith.cmpi slt, %7, %11 : vector<8x128xi32>
    %13 = arith.andi %10, %12 : vector<8x128xi1>
    %c-1_i32 = arith.constant -1 : i32
    %14 = vector.broadcast %c-1_i32 : i32 to vector<8x1xi32>
    %15 = arith.cmpi ne, %8, %14 : vector<8x1xi32>
    %cst_9 = arith.constant -1.000000e+30 : f32
    %16 = vector.broadcast %cst_9 : f32 to vector<8x128xf32>
    %17 = arith.select %13, %5, %16 : vector<8x128xi1>, vector<8x128xf32>
    %cst_10 = arith.constant dense<0xFF800000> : vector<8xf32>
    %18 = vector.multi_reduction <maximumf>, %17, %cst_10 [1] : vector<8x128xf32> to vector<8xf32>
    %19 = vector.shape_cast %18 : vector<8xf32> to vector<8x1xf32>
    %20 = vector.broadcast %19 : vector<8x1xf32> to vector<8x128xf32>
    %21 = arith.subf %17, %20 : vector<8x128xf32>
    %22 = math.exp %21 : vector<8x128xf32>
    %cst_11 = arith.constant 0.000000e+00 : f32
    %23 = vector.broadcast %cst_11 : f32 to vector<8x128xf32>
    %24 = arith.select %13, %22, %23 : vector<8x128xi1>, vector<8x128xf32>
    %cst_12 = arith.constant dense<0.000000e+00> : vector<8xf32>
    %25 = vector.multi_reduction <add>, %24, %cst_12 [1] : vector<8x128xf32> to vector<8xf32>
    %26 = vector.shape_cast %25 : vector<8xf32> to vector<8x1xf32>
    %27 = math.log %26 : vector<8x1xf32>
    %28 = arith.addf %19, %27 : vector<8x1xf32>
    %c0_i32_13 = arith.constant 0 : i32
    %29 = vector.broadcast %c0_i32_13 : i32 to vector<8x1xi32>
    %30 = arith.addi %8, %29 : vector<8x1xi32>
    %31 = vector.broadcast %30 : vector<8x1xi32> to vector<8x128xi32>
    %32 = arith.cmpi eq, %7, %31 : vector<8x128xi32>
    %cst_14 = arith.constant 0.000000e+00 : f32
    %33 = vector.broadcast %cst_14 : f32 to vector<8x128xf32>
    %34 = arith.select %32, %5, %33 : vector<8x128xi1>, vector<8x128xf32>
    %cst_15 = arith.constant dense<0.000000e+00> : vector<8xf32>
    %35 = vector.multi_reduction <add>, %34, %cst_15 [1] : vector<8x128xf32> to vector<8xf32>
    %36 = vector.shape_cast %35 : vector<8xf32> to vector<8x1xf32>
    %37 = arith.subf %28, %36 : vector<8x1xf32>
    %cst_16 = arith.constant 0.000000e+00 : f32
    %38 = vector.broadcast %cst_16 : f32 to vector<8x1xf32>
    %39 = arith.select %15, %37, %38 : vector<8x1xi1>, vector<8x1xf32>
    %40 = vector.shape_cast %39 : vector<8x1xf32> to vector<1x8x1xf32>
    %cst_17 = arith.constant dense<0.000000e+00> : vector<1xf32>
    %41 = vector.multi_reduction <add>, %40, %cst_17 [1, 2] : vector<1x8x1xf32> to vector<1xf32>
    %42 = vector.shape_cast %41 : vector<1xf32> to vector<1x1x1xf32>
    %43 = vector.extract %42[0, 0, 0] : f32 from vector<1x1x1xf32>
    %44 = arith.extui %15 : vector<8x1xi1> to vector<8x1xi32>
    %45 = arith.sitofp %44 : vector<8x1xi32> to vector<8x1xf32>
    %46 = vector.shape_cast %45 : vector<8x1xf32> to vector<1x8x1xf32>
    %cst_18 = arith.constant dense<0.000000e+00> : vector<1xf32>
    %47 = vector.multi_reduction <add>, %46, %cst_18 [1, 2] : vector<1x8x1xf32> to vector<1xf32>
    %48 = vector.shape_cast %47 : vector<1xf32> to vector<1x1x1xf32>
    %49 = vector.extract %48[0, 0, 0] : f32 from vector<1x1x1xf32>
    %c0_19 = arith.constant 0 : index
    %c0_20 = arith.constant 0 : index
    %50 = vector.load %arg5[%c0_19, %c0_20] : memref<8x1xi32, #tpu.memory_space<vmem>>, vector<8x1xi32>
    %c8_i32_21 = arith.constant 8 : i32
    %51 = vector.broadcast %c8_i32_21 : i32 to vector<8x128xi32>
    %52 = arith.cmpi sge, %7, %51 : vector<8x128xi32>
    %c24_i32 = arith.constant 24 : i32
    %53 = vector.broadcast %c24_i32 : i32 to vector<8x128xi32>
    %54 = arith.cmpi slt, %7, %53 : vector<8x128xi32>
    %55 = arith.andi %52, %54 : vector<8x128xi1>
    %c-1_i32_22 = arith.constant -1 : i32
    %56 = vector.broadcast %c-1_i32_22 : i32 to vector<8x1xi32>
    %57 = arith.cmpi ne, %50, %56 : vector<8x1xi32>
    %cst_23 = arith.constant -1.000000e+30 : f32
    %58 = vector.broadcast %cst_23 : f32 to vector<8x128xf32>
    %59 = arith.select %55, %5, %58 : vector<8x128xi1>, vector<8x128xf32>
    %cst_24 = arith.constant dense<0xFF800000> : vector<8xf32>
    %60 = vector.multi_reduction <maximumf>, %59, %cst_24 [1] : vector<8x128xf32> to vector<8xf32>
    %61 = vector.shape_cast %60 : vector<8xf32> to vector<8x1xf32>
    %62 = vector.broadcast %61 : vector<8x1xf32> to vector<8x128xf32>
    %63 = arith.subf %59, %62 : vector<8x128xf32>
    %64 = math.exp %63 : vector<8x128xf32>
    %cst_25 = arith.constant 0.000000e+00 : f32
    %65 = vector.broadcast %cst_25 : f32 to vector<8x128xf32>
    %66 = arith.select %55, %64, %65 : vector<8x128xi1>, vector<8x128xf32>
    %cst_26 = arith.constant dense<0.000000e+00> : vector<8xf32>
    %67 = vector.multi_reduction <add>, %66, %cst_26 [1] : vector<8x128xf32> to vector<8xf32>
    %68 = vector.shape_cast %67 : vector<8xf32> to vector<8x1xf32>
    %69 = math.log %68 : vector<8x1xf32>
    %70 = arith.addf %61, %69 : vector<8x1xf32>
    %c8_i32_27 = arith.constant 8 : i32
    %71 = vector.broadcast %c8_i32_27 : i32 to vector<8x1xi32>
    %72 = arith.addi %50, %71 : vector<8x1xi32>
    %73 = vector.broadcast %72 : vector<8x1xi32> to vector<8x128xi32>
    %74 = arith.cmpi eq, %7, %73 : vector<8x128xi32>
    %cst_28 = arith.constant 0.000000e+00 : f32
    %75 = vector.broadcast %cst_28 : f32 to vector<8x128xf32>
    %76 = arith.select %74, %5, %75 : vector<8x128xi1>, vector<8x128xf32>
    %cst_29 = arith.constant dense<0.000000e+00> : vector<8xf32>
    %77 = vector.multi_reduction <add>, %76, %cst_29 [1] : vector<8x128xf32> to vector<8xf32>
    %78 = vector.shape_cast %77 : vector<8xf32> to vector<8x1xf32>
    %79 = arith.subf %70, %78 : vector<8x1xf32>
    %cst_30 = arith.constant 0.000000e+00 : f32
    %80 = vector.broadcast %cst_30 : f32 to vector<8x1xf32>
    %81 = arith.select %57, %79, %80 : vector<8x1xi1>, vector<8x1xf32>
    %82 = vector.shape_cast %81 : vector<8x1xf32> to vector<1x8x1xf32>
    %cst_31 = arith.constant dense<0.000000e+00> : vector<1xf32>
    %83 = vector.multi_reduction <add>, %82, %cst_31 [1, 2] : vector<1x8x1xf32> to vector<1xf32>
    %84 = vector.shape_cast %83 : vector<1xf32> to vector<1x1x1xf32>
    %85 = vector.extract %84[0, 0, 0] : f32 from vector<1x1x1xf32>
    %86 = arith.extui %57 : vector<8x1xi1> to vector<8x1xi32>
    %87 = arith.sitofp %86 : vector<8x1xi32> to vector<8x1xf32>
    %88 = vector.shape_cast %87 : vector<8x1xf32> to vector<1x8x1xf32>
    %cst_32 = arith.constant dense<0.000000e+00> : vector<1xf32>
    %89 = vector.multi_reduction <add>, %88, %cst_32 [1, 2] : vector<1x8x1xf32> to vector<1xf32>
    %90 = vector.shape_cast %89 : vector<1xf32> to vector<1x1x1xf32>
    %91 = vector.extract %90[0, 0, 0] : f32 from vector<1x1x1xf32>
    %92 = tpu.iota {dimensions = array<i32: 1>} : vector<8x128xi32>
    %c0_i32_33 = arith.constant 0 : i32
    %93 = vector.broadcast %c0_i32_33 : i32 to vector<8x128xi32>
    %94 = arith.cmpi eq, %92, %93 : vector<8x128xi32>
    %c1_i32 = arith.constant 1 : i32
    %95 = vector.broadcast %c1_i32 : i32 to vector<8x128xi32>
    %96 = arith.cmpi eq, %92, %95 : vector<8x128xi32>
    %c2_i32 = arith.constant 2 : i32
    %97 = vector.broadcast %c2_i32 : i32 to vector<8x128xi32>
    %98 = arith.cmpi eq, %92, %97 : vector<8x128xi32>
    %c3_i32 = arith.constant 3 : i32
    %99 = vector.broadcast %c3_i32 : i32 to vector<8x128xi32>
    %100 = arith.cmpi eq, %92, %99 : vector<8x128xi32>
    %cst_34 = arith.constant 0.000000e+00 : f32
    %101 = vector.broadcast %91 : f32 to vector<8x128xf32>
    %102 = vector.broadcast %cst_34 : f32 to vector<8x128xf32>
    %103 = arith.select %100, %101, %102 : vector<8x128xi1>, vector<8x128xf32>
    %104 = vector.broadcast %85 : f32 to vector<8x128xf32>
    %105 = arith.select %98, %104, %103 : vector<8x128xi1>, vector<8x128xf32>
    %106 = vector.broadcast %49 : f32 to vector<8x128xf32>
    %107 = arith.select %96, %106, %105 : vector<8x128xi1>, vector<8x128xf32>
    %108 = vector.broadcast %43 : f32 to vector<8x128xf32>
    %109 = arith.select %94, %108, %107 : vector<8x128xi1>, vector<8x128xf32>
    %c0_35 = arith.constant 0 : index
    %c0_36 = arith.constant 0 : index
    %c0_37 = arith.constant 0 : index
    %110 = vector.load %arg7[%c0_35, %c0_36, %c0_37] : memref<1x8x128xf32, #tpu.memory_space<vmem>>, vector<1x8x128xf32>
    %111 = vector.shape_cast %110 : vector<1x8x128xf32> to vector<8x128xf32>
    %112 = vector.shape_cast %109 : vector<8x128xf32> to vector<1x8x128xf32>
    tpu.vector_store %arg7[%c0_35, %c0_36, %c0_37], %112 {strides = array<i32>} : memref<1x8x128xf32, #tpu.memory_space<vmem>>, vector<1x8x128xf32>,
    return
  }
  func.func @transform_0(%arg0: i32) -> (i32, i32) {
    %c0_i32 = arith.constant 0 : i32
    %c0_i32_0 = arith.constant 0 : i32
    return %arg0, %c0_i32 : i32, i32
  }
  func.func @transform_1(%arg0: i32) -> (i32, i32) {
    %c0_i32 = arith.constant 0 : i32
    %c0_i32_0 = arith.constant 0 : i32
    %c0_i32_1 = arith.constant 0 : i32
    return %c0_i32, %c0_i32_0 : i32, i32
  }
  func.func @transform_2(%arg0: i32) -> (i32, i32) {
    %c0_i32 = arith.constant 0 : i32
    %c0_i32_0 = arith.constant 0 : i32
    %c0_i32_1 = arith.constant 0 : i32
    return %c0_i32, %c0_i32_0 : i32, i32
  }
  func.func @transform_3(%arg0: i32) -> (i32, i32) {
    %c0_i32 = arith.constant 0 : i32
    %c0_i32_0 = arith.constant 0 : i32
    return %arg0, %c0_i32 : i32, i32
  }
  func.func @transform_4(%arg0: i32) -> (i32, i32) {
    %c0_i32 = arith.constant 0 : i32
    %c0_i32_0 = arith.constant 0 : i32
    return %arg0, %c0_i32 : i32, i32
  }
  func.func @transform_5(%arg0: i32) -> (i32, i32) {
    %c0_i32 = arith.constant 0 : i32
    %c0_i32_0 = arith.constant 0 : i32
    return %arg0, %c0_i32 : i32, i32
  }
  func.func @transform_6(%arg0: i32) -> (i32, i32, i32) {
    %c0_i32 = arith.constant 0 : i32
    %c0_i32_0 = arith.constant 0 : i32
    %c0_i32_1 = arith.constant 0 : i32
    return %arg0, %c0_i32, %c0_i32_0 : i32, i32, i32
  }
}

</mosaic_0001>

<bundles_post_ra>
// kernel: tpu_custom_call.1
= control target key start
LH: loop header
LB: loop body
LE: loop exit
PB: predicated region body
PF: predicated region fallthrough
CT: control target
= control target key end

     0   :  { %12 = vsyncpa [#allocation3], 0  ;;  %s1187_s0 = inlined_call_operand.hbm [shape: f32[24,32], index: 0, kind: input, shape index: {}]   ;;  %s1188_s1 = inlined_call_operand.vmem [shape: f32[32,128], index: 1, kind: input, shape index: {}]   ;;  %s1189_s2 = inlined_call_operand.vmem [shape: f32[1,128], index: 2, kind: input, shape index: {}]   ;;  %s1190_s3 = inlined_call_operand.vmem [shape: s32[24,1], index: 3, kind: input, shape index: {}]   ;;  %s1191_s4 = inlined_call_operand.vmem [shape: s32[24,1], index: 4, kind: input, shape index: {}]   ;;  %s1192_s5 = inlined_call_operand.hbm [shape: f32[24,128], index: 5, kind: output, shape index: {0}]   ;;  %s1193_s6 = inlined_call_operand.hbm [shape: f32[3,8,128], index: 6, kind: output, shape index: {1}]  }
   0x1   :  { %14 = vsyncpa [#allocation3 + $0x1], 0 }
   0x2   :  { %15 = vsyncpa [#allocation4], 0 }
   0x3   :  { %17 = vsyncpa [#allocation4 + $0x1], 0 }
   0x4   :  { %18 = vsyncpa [#allocation7], 0 }
   0x5   :  { %20 = vsyncpa [#allocation7 + $0x1], 0  ;;  %s944_s21 = smov 0   ;;  %s946_s22 = smov 0  }
   0x6   :  { %s948_s23 = smov 0   ;;  %s950_s24 = smov 0  }
   0x7 LB: > { %s965_s25 = sadd.s32 4294967295, %s901_s24   ;;  %s670_s26 = sadd.s32 4294967294, %s901_s24   ;;  %s901_s24 = sphi %s950_s24, %s1213_s24   ;;  %s897_s23 = sphi %s948_s23, %s1212_s23   ;;  %s893_s22 = sphi %s946_s22, %s1211_s22   ;;  %s889_s21 = sphi %s944_s21, %s1210_s21  }
   0x8   : > { %s969_s27 = sadd.s32 1, %s901_s24   ;;  %s33_s28 = sadd.s32 1, %s897_s23 }
   0x9   : > { %s30_s29 = ssub.s32 %s901_s24, %s969_s27  ;;  %p40_p0 = scmp.ne.s32.totalorder %s897_s23, %s893_s22 }
   0xa   : > { %p31_p1 = scmp.eq.s32.totalorder %s30_s29, 0  ;;  %p41_p2 = scmp.eq.s32.totalorder %s901_s24, 0 }
   0xb   : > { %p46_p3 = scmp.ne.s32.totalorder %s893_s22, %s889_s21  ;;  %p47_p4 = scmp.eq.s32.totalorder %s965_s25, 0 }
   0xc   : > { %s981_s30 = scalar_select %p31_p1, %s897_s23, %s33_s28  }
   0xd   : > { %p983_p5 = por %p41_p2, %p40_p0  ;;  %p987_p6 = por %p47_p4, %p46_p3 }
   0xe   : > { %p164_p7 = scmp.eq.s32.totalorder %s965_s25, 2  ;;  %p170_p8 = scmp.eq.s32.totalorder %s670_s26, 2 }
   0xf   : > { %s1198_s8 = scalar_select %p987_p6, 1, 0 }
  0x10   : > { %p732_p9 = scmp.lt.s32.totalorder %s901_s24, 3  ;;  %p993_p10 = por %p164_p7, %p40_p0 }
  0x11   : > { %p997_p11 = por %p170_p8, %p46_p3  ;;  %s222_s11 = sand.u32 1, %s897_s23  }
  0x12   : > { %s1199_s9 = scalar_select %p993_p10, 1, 0 }
  0x13   : > { %s1200_s10 = scalar_select %p997_p11, 1, 0 }
  0x14   : > { %s674_s12 = sshll.u32 %s901_s24, 7  ;;  %s673_s13 = sshll.u32 %s222_s11, 3 }
  0x15   : > { %s1006_s16 = scalar_lea.hbm %s1187_s0, %s674_s12  ;;  %s226_s17 = scalar_lea.vmem [#allocation2], %s673_s13 }
  0x16   : > { %s233_s18 = sshll.u32 %s226_s17, 4  ;;  %p1010_p12 = pnand %p732_p9, %p983_p5  ;;  %s1014_s18 = int_to_ptr.vmem [resolvable:$true] %s233_s18 }
  0x17   : > { %s223_s20 = scalar_lea.sflag [#allocation3], %s222_s11  ;;  %s779_s26 = scalar_lea.hbm %s1006_s16, 128 }
  0x18   : > { %p780_p1 = scmp.ne.s32.totalorder %s1006_s16, %s779_s26  ;;  %p781_p2 = pneg %p1010_p12 }
  0x19   : > { %s784_s7 = scalar_lea.hbm %s1187_s0, 384  ;;  %p785_p5 = scmp.lt.s32.totalorder %s1006_s16, %s1187_s0 }
  0x1a   : > { %p782_p3 = pnand %p781_p2, %p780_p1  ;;  %p786_p7 = scmp.lt.s32.totalorder %s784_s7, %s779_s26 }
  0x1c   : > { %p783_p4 = pneg %p782_p3  ;;  %p787_p8 = por %p786_p7, %p785_p5 }
  0x1e   : > { %p788_p9 = pnand %p787_p8, %p783_p4 }
  0x20   : > { %791 = shalt.err (!%p788_p9)
}
  0x21   : > { %s792_s11 = scalar_lea.vmem %s1014_s18, 128  ;;  %s903_s14 = smov [#allocation2]  }
  0x22   : > { %p793_p13 = scmp.ne.s32.totalorder %s1014_s18, %s792_s11  ;;  %s797_s15 = sshll.u32 %s903_s14, 4  ;;  %s798_s15 = int_to_ptr.vmem [resolvable:$false] %s797_s15 }
  0x23   : > { %s799_s17 = scalar_lea.vmem %s798_s15, 256  ;;  %p800_p3 = scmp.lt.s32.totalorder %s1014_s18, %s798_s15 }
  0x24   : > { %p795_p0 = pnand %p793_p13, %p781_p2  ;;  %p801_p11 = scmp.lt.s32.totalorder %s799_s17, %s792_s11 }
  0x26   : > { %p796_p1 = pneg %p795_p0  ;;  %p802_p10 = por %p801_p11, %p800_p3 }
  0x28   : > { %p803_p6 = pnand %p802_p10, %p796_p1 }
  0x2a   : > { %806 = shalt.err (!%p803_p6)
}
  0x2b   : > { %724 = dma.hbm_to_vmem [thread:$0]  (!%p1010_p12), %s1006_s16, 128, %s1014_s18, %s223_s20  }
  0x2c   : > { %p1202_p4 = scmp.lt.s32.totalorder %s901_s24, 4  ;;  %p1203_p5 = scmp.ge.s32.totalorder %s901_s24, 1 }
  0x2e   : > { %p253_p13 = pnand %p1203_p5, %p1202_p4 }
  0x2f   : > { %s1041_s26 = sand.u32 (!%p253_p13), 1, %s893_s22   ;;  %p1204_p6 = scmp.ne.s32.totalorder (!%p253_p13), %s1198_s8, 0 }
  0x30   : > { %256 = sbr.rel (%p253_p13) target bundleno = 803 (0x323), region = 40  ;;  %s1044_s28 = sshll.u32 (!%p253_p13), %s1041_s26, 3 }
  0x31   : > { %s259_s29 = scalar_lea.sflag (!%p253_p13), [#allocation3], %s1041_s26  ;;  %s262_s19 = scalar_lea.vmem (!%p253_p13), [#allocation2], %s1044_s28 }
  0x35   : > { %876 = dma.done.wait (%p1204_p6), %s259_s29, 128  }
  0x36   : > { %878 = vsyncadd (%p1204_p6), %s259_s29, 4294967168  ;;  %p304_p10 = scmp.lt.s32.totalorder %s965_s25, 2  ;;  %v904_v0 = vmov 0.0   ;;  %vm905_vm0 = vmmov 0   ;;  %v906_v1 = vmov 0   ;;  %v316_v2 = vld [vmem:[%s1188_s1 + $0x18] sm:$0xff]  ;;  %v399_v10 = vlaneseq }
  0x37   : > { %696 = vmatprep.subr.mxu0 %v904_v0  ;;  %704 = vmatprep.mubr.msk.f32.mxu0 %vm905_vm0, %v904_v0  ;;  %v315_v3 = vld [vmem:[%s1188_s1 + $0x10] sm:$0xff]  ;;  %v314_v5 = vld [vmem:[%s1188_s1 + $0x8] sm:$0xff]  ;;  %v313_v8 = vld [vmem:[%s1188_s1] sm:$0xff]  ;;  %vm324_vm1 = vcmask 261120   ;;  %vm427_vm9 = vcmask 7168   ;;  %s1196_s13 = sshll.u32 %s965_s25, 7 }
  0x38   : > { %769 = vset.pattern.permute.xlu1 %v906_v1  ;;  %s305_s16 = scalar_select %p304_p10, %s965_s25, 2  ;;  %770 = vset.pattern.permute.xlu0 %v906_v1  ;;  %v312_v9 = vld [vmem:[%s262_s19] sm:$0xff]  ;;  %v1083_v11 = vand.u32 127, %v399_v10 }
  0x39   : > { %697 = vmatpush3.msra.mxu0 %v316_v2  ;;  %v681_v12 = vld [vmem:[%s1189_s2] ss:$0 sm:$0xff]  ;;  %s296_s19 = scalar_lea.vmem [#allocation5], %s1044_s28  ;;  %s529_s15 = scalar_lea.hbm %s1192_s5, %s1196_s13 }
  0x3a   : > { %s679_s18 = sshll.u32 %s305_s16, 3  ;;  %698 = vmatprep.subr.mxu0 %v904_v0  ;;  %vm403_vm2 = vcmp.lt.s32.totalorder %v1083_v11, 8  ;;  %vm451_vm3 = vcmp.ge.s32.totalorder %v1083_v11, 8  ;;  %vm452_vm4 = vcmp.lt.s32.totalorder %v1083_v11, 24  ;;  %s531_s17 = sshll.u32 %s296_s19, 4  ;;  %s532_s17 = int_to_ptr.vmem [resolvable:$true] %s531_s17 }
  0x3b   : > { %s307_s12 = scalar_lea.vmem %s1190_s3, %s679_s18  ;;  %s311_s11 = scalar_lea.vmem %s1191_s4, %s679_s18  ;;  %699 = vmatpush3.msra.mxu0 %v315_v3  ;;  %vm1096_vm5 = vmand %vm451_vm3, %vm452_vm4 }
  0x3c   : > { %v1068_v4 = vld [vmem:[%s307_s12] sm:$0xff]  ;;  %700 = vmatprep.subr.mxu0 %v904_v0  ;;  %s513_s29 = scalar_lea.sflag [#allocation4], %s1041_s26  ;;  %s807_s16 = scalar_lea.vmem %s532_s17, 128 }
  0x3d   : > { %v1074_v6 = vld [vmem:[%s311_s11] sm:$0xff]  ;;  %419 = vperm.xlu1 %769, %v1068_v4   ;;  %701 = vmatpush3.msra.mxu0 %v314_v5  ;;  %vm405_vm8 = vcmp.ne.s32.totalorder %v1068_v4, 4294967295  ;;  %p808_p11 = scmp.ne.s32.totalorder %s532_s17, %s807_s16  ;;  %p1207_p12 = scmp.ne.s32.totalorder %s1199_s9, 0 }
  0x3e   : > { %v467_v7 = vadd.s32 8, %v1074_v6  ;;  %702 = vmatprep.subr.mxu0 %v904_v0  ;;  %v683_v33 = vsel %vm405_vm8, 1.0, %v904_v0  ;;  %vm454_vm10 = vcmp.ne.s32.totalorder %v1074_v6, 4294967295  ;;  %s907_s20 = smov [#allocation5]  }
  0x3f   : > { %703 = vmatpush3.msra.mxu0 %v313_v8  ;;  %v440_v34 = vsel %vm427_vm9, %v683_v33, 0.0  ;;  %v684_v50 = vsel %vm454_vm10, 1.0, %v904_v0  ;;  %p809_p0 = pnand %p808_p11, %p1207_p12  ;;  %s811_s18 = sshll.u32 %s907_s20, 4  ;;  %s812_s18 = int_to_ptr.vmem [resolvable:$false] %s811_s18 }
  0x40   : > { %705 = vmatmul.mubr.msk.f32.vlgmr.msra.gmra.mxu0 %vm324_vm1, %v312_v9  ;;  %v489_v52 = vsel %vm427_vm9, %v684_v50, 0.0  ;;  %s813_s7 = scalar_lea.vmem %s812_s18, 256  ;;  %p814_p7 = scmp.lt.s32.totalorder %s532_s17, %s812_s18 }
  0x41   : > { %469 = vperm.xlu1 %769, %v467_v7   ;;  %p810_p2 = pneg %p809_p0  ;;  %p815_p8 = scmp.lt.s32.totalorder %s813_s7, %s807_s16 }
  0x43   : > { %p816_p9 = por %p815_p8, %p814_p7 }
  0x45   : > { %p817_p1 = pnand %p816_p9, %p810_p2 }
  0xb8   : > { %v420_v25 = vpop.permute.xlu1 %419 }
  0xb9   : > { %vm421_vm6 = vcmp.eq.s32.totalorder %v1083_v11, %v420_v25 }
  0xbc   : > { %v470_v28 = vpop.permute.xlu1 %469 }
  0xbd   : > { %vm471_vm7 = vcmp.eq.s32.totalorder %v1083_v11, %v470_v28 }
 0x100   : > { %v394_v13 = vpop.f32.mrf.mxu0 }
 0x101   : > { %v395_v14 = vadd.f32 %v681_v12, %v394_v13 }
 0x102   : > { %v706_v15 = vpop.f32.mrf.mxu0 }
 0x103   : > { %v406_v16 = vsel %vm403_vm2, %v395_v14, -1e+30  ;;  %398 = vst [vmem:[%s296_s19] sm:$0xff] %v395_v14  ;;  %v455_v18 = vsel %vm1096_vm5, %v395_v14, -1e+30  ;;  %v422_v30 = vsel %vm421_vm6, %v395_v14, 0.0  ;;  %v472_v32 = vsel %vm471_vm7, %v395_v14, 0.0 }
 0x104   : > { %407 = vmax.xlane.f32.xlu0 %v406_v16 }
 0x108   : > { %456 = vmax.xlane.f32.xlu0 %v455_v18 }
 0x18d   : > { %v408_v19 = vpop.xlane.xlu0 %407 }
 0x18e   : > { %v409_v20 = vsub.f32 %v406_v16, %v408_v19 }
 0x190   : > { %v410_v21 = vmul.f32 1.442695, %v409_v20 }
 0x191   : > { %v457_v22 = vpop.xlane.xlu0 %456 }
 0x192   : > { %771 = vpow2.f32 %v410_v21  ;;  %v458_v23 = vsub.f32 %v455_v18, %v457_v22 }
 0x194   : > { %v459_v24 = vmul.f32 1.442695, %v458_v23 }
 0x196   : > { %773 = vpow2.f32 %v459_v24 }
 0x19f   : > { %v772_v26 = vpop.eup %771 }
 0x1a0   : > { %v412_v27 = vsel %vm403_vm2, %v772_v26, 0.0 }
 0x1a1   : > { %413 = vadd.xlane.f32.xlu0 %v412_v27 }
 0x1a3   : > { %v774_v29 = vpop.eup %773 }
 0x1a4   : > { %v461_v31 = vsel %vm1096_vm5, %v774_v29, 0.0 }
 0x1a5   : > { %423 = vadd.xlane.f32.xlu0 %v422_v30  ;;  %462 = vadd.xlane.f32.xlu1 %v461_v31 }
 0x1a9   : > { %473 = vadd.xlane.f32.xlu0 %v472_v32 }
 0x1ad   : > { %441 = vadd.xlane.f32.xlu0 %v440_v34 }
 0x22a   : > { %v414_v35 = vpop.xlane.xlu0 %413 }
 0x22b   : > { %775 = vlog2.f32 %v414_v35 }
 0x22e   : > { %v463_v36 = vpop.xlane.xlu1 %462  ;;  %v424_v39 = vpop.xlane.xlu0 %423 }
 0x22f   : > { %777 = vlog2.f32 %v463_v36 }
 0x232   : > { %v474_v46 = vpop.xlane.xlu0 %473 }
 0x238   : > { %v776_v37 = vpop.eup %775 }
 0x239   : > { %v416_v38 = vmul.f32 0.6931472, %v776_v37 }
 0x23b   : > { %v417_v40 = vadd.f32 %v416_v38, %v408_v19 }
 0x23c   : > { %v778_v41 = vpop.eup %777 }
 0x23d   : > { %v465_v42 = vmul.f32 0.6931472, %v778_v41  ;;  %v425_v43 = vsub.f32 %v417_v40, %v424_v39 }
 0x23f   : > { %v466_v44 = vadd.f32 %v465_v42, %v457_v22  ;;  %v426_v45 = vsel %vm405_vm8, %v425_v43, 0.0 }
 0x240   : > { %v428_v47 = vsel %vm427_vm9, %v426_v45, 0.0 }
 0x241   : > { %v475_v48 = vsub.f32 %v466_v44, %v474_v46  ;;  %429 = vadd.xlane.f32.xlu0 %v428_v47 }
 0x243   : > { %v476_v49 = vsel %vm454_vm10, %v475_v48, 0.0 }
 0x244   : > { %v477_v51 = vsel %vm427_vm9, %v476_v49, 0.0 }
 0x245   : > { %478 = vadd.xlane.f32.xlu0 %v477_v51 }
 0x249   : > { %490 = vadd.xlane.f32.xlu0 %v489_v52 }
 0x24a   : > { %820 = shalt.err (!%p817_p1)
}
 0x24b   : > { %s821_s12 = scalar_lea.hbm %s529_s15, 128  ;;  %s825_s11 = scalar_lea.hbm %s1192_s5, 384 }
 0x24c   : > { %p822_p3 = scmp.ne.s32.totalorder %s529_s15, %s821_s12  ;;  %p826_p13 = scmp.lt.s32.totalorder %s529_s15, %s1192_s5 }
 0x24d   : > { %p827_p6 = scmp.lt.s32.totalorder %s825_s11, %s821_s12 }
 0x24e   : > { %p823_p4 = pnand %p822_p3, %p1207_p12 }
 0x24f   : > { %p828_p10 = por %p827_p6, %p826_p13 }
 0x250   : > { %p824_p5 = pneg %p823_p4 }
 0x252   : > { %p829_p11 = pnand %p828_p10, %p824_p5 }
 0x254   : > { %832 = shalt.err (!%p829_p11)
}
 0x255   : > { %717 = dma.vmem_to_hbm [thread:$0]  (%p1207_p12), %s532_s17, 128, %s529_s15, %s513_s29   ;;  %v442_v53 = vpop.xlane.xlu0 %441  ;;  %vm502_vm11 = vcmp.eq.s32.totalorder %v1083_v11, 3  ;;  %vm501_vm12 = vcmp.eq.s32.totalorder %v1083_v11, 2  ;;  %vm500_vm13 = vcmp.eq.s32.totalorder %v1083_v11, 1  ;;  %vm499_vm14 = vcmp.eq.s32.totalorder %v1083_v11, 0 }
 0x256   : > { %v443_v54 = vrot.slane %v442_v53, 4  ;;  %s303_s16 = scalar_lea.vmem [#allocation6], %s1044_s28  ;;  %s1208_s18 = sshll.u32 %s965_s25, 7 }
 0x257   : > { %s544_s20 = sshll.u32 %s303_s16, 4  ;;  %s1151_s8 = scalar_lea.hbm %s1193_s6, %s1208_s18  ;;  %s545_s20 = int_to_ptr.vmem [resolvable:$true] %s544_s20 }
 0x258   : > { %v444_v55 = vadd.f32 %v443_v54, %v442_v53  ;;  %s518_s28 = scalar_lea.sflag [#allocation7], %s1041_s26  ;;  %s833_s19 = scalar_lea.vmem %s545_s20, 128 }
 0x259   : > { %p834_p0 = scmp.ne.s32.totalorder %s545_s20, %s833_s19  ;;  %s908_s11 = smov [#allocation6]  }
 0x25a   : > { %v445_v56 = vrot.slane %v444_v55, 2  ;;  %s837_s14 = sshll.u32 %s908_s11, 4  ;;  %s838_s14 = int_to_ptr.vmem [resolvable:$false] %s837_s14 }
 0x25b   : > { %p835_p2 = pnand %p834_p0, %p1207_p12  ;;  %p840_p8 = scmp.lt.s32.totalorder %s545_s20, %s838_s14 }
 0x25c   : > { %v446_v61 = vadd.f32 %v445_v56, %v444_v55 }
 0x25d   : > { %p836_p7 = pneg %p835_p2 }
 0x25e   : > { %v447_v3 = vrot.slane %v446_v61, 1 }
 0x260   : > { %v448_v10 = vadd.f32 %v447_v3, %v446_v61 }
 0x2ca   : > { %v430_v57 = vpop.xlane.xlu0 %429 }
 0x2cb   : > { %v431_v58 = vrot.slane %v430_v57, 4 }
 0x2cd   : > { %v432_v59 = vadd.f32 %v431_v58, %v430_v57 }
 0x2ce   : > { %v479_v60 = vpop.xlane.xlu0 %478 }
 0x2cf   : > { %v433_v62 = vrot.slane %v432_v59, 2  ;;  %v480_v63 = vrot.slane %v479_v60, 4 }
 0x2d1   : > { %v481_v0 = vadd.f32 %v480_v63, %v479_v60  ;;  %v434_v1 = vadd.f32 %v433_v62, %v432_v59 }
 0x2d2   : > { %v491_v2 = vpop.xlane.xlu0 %490 }
 0x2d3   : > { %v482_v4 = vrot.slane %v481_v0, 2  ;;  %v492_v5 = vrot.slane %v491_v2, 4  ;;  %v435_v6 = vrot.slane %v434_v1, 1 }
 0x2d5   : > { %v493_v7 = vadd.f32 %v492_v5, %v491_v2  ;;  %v436_v8 = vadd.f32 %v435_v6, %v434_v1  ;;  %v483_v9 = vadd.f32 %v482_v4, %v481_v0 }
 0x2d7   : > { %v494_v12 = vrot.slane %v493_v7, 2  ;;  %707 = vpush %v436_v8  ;;  %v484_v13 = vrot.slane %v483_v9, 1 }
 0x2d8   : > { %709 = vpush %v448_v10 }
 0x2d9   : > { %v495_v14 = vadd.f32 %v494_v12, %v493_v7  ;;  %v485_v15 = vadd.f32 %v484_v13, %v483_v9 }
 0x2db   : > { %711 = vpush %v485_v15  ;;  %v496_v16 = vrot.slane %v495_v14, 1 }
 0x2dd   : > { %v497_v17 = vadd.f32 %v496_v16, %v495_v14 }
 0x2df   : > { %713 = vpush %v497_v17 }
 0x308   : > { %s708_s13 = spop %707 }
 0x309   : > { %s710_s15 = spop %709  ;;  %v509_v23 = vstv %s708_s13  ;;  %s839_s13 = scalar_lea.vmem %s838_s14, 256 }
 0x30a   : > { %v507_v21 = vstv %s710_s15  ;;  %p841_p9 = scmp.lt.s32.totalorder %s839_s13, %s833_s19 }
 0x30c   : > { %s712_s17 = spop %711  ;;  %p842_p1 = por %p841_p9, %p840_p8 }
 0x30d   : > { %v505_v19 = vstv %s712_s17 }
 0x30e   : > { %p843_p3 = pnand %p842_p1, %p836_p7 }
 0x310   : > { %s714_s29 = spop %713 }
 0x311   : > { %v503_v18 = vstv %s714_s29 }
 0x312   : > { %v504_v20 = vsel %vm502_vm11, %v503_v18, 0.0 }
 0x313   : > { %v506_v22 = vsel %vm501_vm12, %v505_v19, %v504_v20 }
 0x314   : > { %v508_v24 = vsel %vm500_vm13, %v507_v21, %v506_v22 }
 0x315   : > { %v510_v25 = vsel %vm499_vm14, %v509_v23, %v508_v24 }
 0x316   : > { %511 = vst [vmem:[%s303_s16] sm:$0xff] %v510_v25 }
 0x317   : > { %846 = shalt.err (!%p843_p3)
}
 0x318   : > { %s847_s25 = scalar_lea.hbm %s1151_s8, 128  ;;  %s851_s17 = scalar_lea.hbm %s1193_s6, 384 }
 0x319   : > { %p848_p4 = scmp.ne.s32.totalorder %s1151_s8, %s847_s25  ;;  %p852_p6 = scmp.lt.s32.totalorder %s1151_s8, %s1193_s6 }
 0x31a   : > { %p853_p10 = scmp.lt.s32.totalorder %s851_s17, %s847_s25 }
 0x31b   : > { %p849_p5 = pnand %p848_p4, %p1207_p12 }
 0x31c   : > { %p854_p11 = por %p853_p10, %p852_p6 }
 0x31d   : > { %p850_p13 = pneg %p849_p5 }
 0x31f   : > { %p855_p0 = pnand %p854_p11, %p850_p13 }
 0x321   : > { %858 = shalt.err (!%p855_p0)
}
 0x322   : > { %718 = dma.vmem_to_hbm [thread:$0]  (%p1207_p12), %s545_s20, 128, %s1151_s8, %s518_s28  }
 0x323 PF: > { %p733_p2 = scmp.ge.s32.totalorder %s901_s24, 2  ;;  %s556_s18 = sand.u32 1, %s889_s21  }
 0x324   : > { %p1209_p7 = scmp.ne.s32.totalorder %s1200_s10, 0  ;;  %s557_s7 = scalar_lea.sflag [#allocation4], %s556_s18 }
 0x326   : > { %p726_p8 = pnand %p733_p2, %p1209_p7 }
 0x328   : > { %p727_p9 = pneg %p726_p8 }
 0x32a   : > { %880 = dma.done.wait (%p727_p9), %s557_s7, 128  }
 0x32b   : > { %882 = vsyncadd (%p727_p9), %s557_s7, 4294967168  ;;  %s566_s12 = scalar_lea.sflag [#allocation7], %s556_s18 }
 0x32c   : > { %884 = dma.done.wait (%p727_p9), %s566_s12, 128  }
 0x32d   : > { %886 = vsyncadd (%p727_p9), %s566_s12, 4294967168  ;;  %p23_p12 = scmp.ge.s32.totalorder %s969_s27, 5   ;;  %s1210_s21 = smov %s893_s22 }
 0x32e   : > { %s1211_s22 = smov %s897_s23  ;;  %s1212_s23 = smov %s981_s30 }
 0x32f   : > { %s1213_s24 = smov %s969_s27  ;;  %25 = sbr.rel (!%p23_p12) target bundleno = 7 (0x7), region = 108 }
 0x334   :  { %571 = vsyncpa [#allocation3], 1 }
 0x335   :  { %573 = vsyncpa [#allocation3 + $0x1], 1 }
 0x336   :  { %574 = vsyncpa [#allocation4], 1 }
 0x337   :  { %576 = vsyncpa [#allocation4 + $0x1], 1 }
 0x338   :  { %577 = vsyncpa [#allocation7], 1 }
 0x339   :  { %579 = vsyncpa [#allocation7 + $0x1], 1 }

</bundles_post_ra>
